<compile_context>
chip_gen: v6e
topology: v6e:2x2x1
jax: 0.10.0
libtpu: 0.0.40
codegen_flags: <defaults>
</compile_context>

<pallas_src>
import jax
import jax.numpy as jnp
from jax.experimental import pallas as pl
from jax.experimental.pallas import tpu as pltpu


# ----------------------------- in-kernel helpers -----------------------------

def _layernorm(x, g, b, eps=1e-5):
    mu = jnp.mean(x, axis=-1, keepdims=True)
    xc = x - mu
    var = jnp.mean(xc * xc, axis=-1, keepdims=True)
    return xc * jax.lax.rsqrt(var + eps) * g + b


def _quick_gelu(x):
    # x * sigmoid(1.702 * x), written explicitly (exp -> EUP, rest -> VPU).
    return x * (1.0 / (1.0 + jnp.exp(-1.702 * x)))


# ------------------------------- Pallas kernels ------------------------------

def _embed_ln_pre_kernel(p_ref, wc_ref, add_ref, g_ref, b_ref, out_ref):
    """conv1 (as patch matmul) + class token + positional embedding + ln_pre.

    p_ref   : (B_TILE, L, Cin) patch pixels; row 0 of L is all-zero (class slot)
    wc_ref  : (Cin, W)         conv weight, flattened & pre-transposed
    add_ref : (L, W)           row 0 = class_embedding + pos[0]; rows 1.. = pos[1:]
    """
    wc = wc_ref[...]
    add = add_ref[...]
    g = g_ref[...]
    b = b_ref[...]
    for bb in range(p_ref.shape[0]):          # static unroll over the batch tile
        tok = jnp.dot(p_ref[bb], wc, preferred_element_type=jnp.float32) + add
        out_ref[bb] = _layernorm(tok, g, b).astype(out_ref.dtype)


def _resblock_kernel(x_ref, ln1g_ref, ln1b_ref,
                     wq_ref, wk_ref, wv_ref, bq_ref, bk_ref, bv_ref,
                     wo_ref, bo_ref,
                     ln2g_ref, ln2b_ref,
                     w1_ref, mb1_ref, w2_ref, mb2_ref,
                     out_ref):
    """One CLIP ResidualAttentionBlock on a (B_TILE, L, W) activation slab.

    NOTE the (unusual) CLIP block: x <- ln_1(x); x <- x + attn(x,x,x);
                                   x <- x + mlp(ln_2(x)).
    Wq / bq arrive pre-scaled by head_dim**-0.5; wo_ref is Wo^T reshaped to
    (H, Dh, W) so head outputs are projected & summed directly (no concat).
    """
    n_heads, head_dim, _ = wo_ref.shape

    # Hoist all weight loads out of the batch loop.
    ln1g = ln1g_ref[...]; ln1b = ln1b_ref[...]
    ln2g = ln2g_ref[...]; ln2b = ln2b_ref[...]
    wq = wq_ref[...]; wk = wk_ref[...]; wv = wv_ref[...]
    bq = bq_ref[...]; bk = bk_ref[...]; bv = bv_ref[...]
    wo = wo_ref[...]; bo = bo_ref[...]
    w1 = w1_ref[...]; mb1 = mb1_ref[...]
    w2 = w2_ref[...]; mb2 = mb2_ref[...]

    for bb in range(x_ref.shape[0]):          # static unroll over the batch tile
        h = _layernorm(x_ref[bb], ln1g, ln1b)                           # (L, W)

        # ---- multi-head self-attention (one big projection per q/k/v) ----
        qp = jnp.dot(h, wq, preferred_element_type=jnp.float32) + bq    # scaled
        kp = jnp.dot(h, wk, preferred_element_type=jnp.float32) + bk
        vp = jnp.dot(h, wv, preferred_element_type=jnp.float32) + bv

        attn_out = bo                                                   # (1, W)
        for hh in range(n_heads):
            sl = slice(hh * head_dim, (hh + 1) * head_dim)
            q_h, k_h, v_h = qp[:, sl], kp[:, sl], vp[:, sl]             # (L, Dh)
            # scores without materializing k_h.T (contract last dims on MXU)
            s = jax.lax.dot_general(q_h, k_h, (((1,), (1,)), ((), ())),
                                    preferred_element_type=jnp.float32)  # (L, L)
            m = jnp.max(s, axis=-1, keepdims=True)
            p = jnp.exp(s - m)
            inv = pl.reciprocal(jnp.sum(p, axis=-1, keepdims=True), approx=True)
            a = p * inv
            o_h = jnp.dot(a, v_h, preferred_element_type=jnp.float32)   # (L, Dh)
            attn_out = attn_out + jnp.dot(o_h, wo[hh],
                                          preferred_element_type=jnp.float32)
        h = h + attn_out

        # ---- MLP: Linear(W,4W) -> QuickGELU -> Linear(4W,W) ----
        y = _layernorm(h, ln2g, ln2b)
        z = jnp.dot(y, w1, preferred_element_type=jnp.float32) + mb1    # (L, 4W)
        z = _quick_gelu(z)
        h = h + jnp.dot(z, w2, preferred_element_type=jnp.float32) + mb2

        out_ref[bb] = h.astype(out_ref.dtype)


def _ln_post_proj_kernel(cls_ref, g_ref, b_ref, proj_ref, out_ref):
    """ln_post on the class tokens, then projection to the multimodal space."""
    x = _layernorm(cls_ref[...], g_ref[...], b_ref[...])                # (N, W)
    out_ref[...] = jnp.dot(x, proj_ref[...],
                           preferred_element_type=jnp.float32).astype(out_ref.dtype)


# --------------------------------- wrapper -----------------------------------

def visual_transformer_forward(x, params, *, patch_size, heads, b_tile=8):
    """x: (N, 3, H, W) float32 -> (N, output_dim). Matches VisualTransformer.forward."""
    N, C, Hh, Ww = x.shape
    ps = patch_size
    gh, gw = Hh // ps, Ww // ps
    P = gh * gw
    L = P + 1
    conv_w = params["conv_w"]                               # (width, C, ps, ps)
    width = conv_w.shape[0]
    cin = C * ps * ps
    head_dim = width // heads
    ffn = 4 * width
    dtype = x.dtype

    b_tile = min(b_tile, N)                                  # whole batch per step here
    grid = (pl.cdiv(N, b_tile),)
    cparams = pltpu.CompilerParams(dimension_semantics=("parallel",))

    def _rep(shape):          # grid-invariant (weights / biases)
        nd = len(shape)
        return pl.BlockSpec(shape, lambda i: (0,) * nd)

    def _tiled(shape):        # batch-tiled activations
        nd = len(shape)
        return pl.BlockSpec(shape, lambda i: (i,) + (0,) * (nd - 1))

    # --- patch extraction (layout only; conv compute runs in the Pallas kernel) ---
    patches = x.reshape(N, C, gh, ps, gw, ps).transpose(0, 2, 4, 1, 3, 5)
    patches = patches.reshape(N, P, cin)
    patches_ext = jnp.concatenate(                           # row 0 = class slot
        [jnp.zeros((N, 1, cin), dtype), patches], axis=1)    # (N, L, cin)

    wcT = conv_w.reshape(width, cin).T                       # (cin, width)
    add_emb = jnp.concatenate(
        [(params["cls"] + params["pos"][0])[None, :], params["pos"][1:]], axis=0)

    tokens = pl.pallas_call(
        _embed_ln_pre_kernel,
        out_shape=jax.ShapeDtypeStruct((N, L, width), dtype),
        grid_spec=pltpu.PrefetchScalarGridSpec(
            num_scalar_prefetch=0,
            grid=grid,
            in_specs=[
                _tiled((b_tile, L, cin)),
                _rep((cin, width)),
                _rep((L, width)),
                _rep((1, width)),
                _rep((1, width)),
            ],
            out_specs=_tiled((b_tile, L, width)),
        ),
        compiler_params=cparams,
    )(patches_ext, wcT, add_emb,
      params["ln_pre_g"][None, :], params["ln_pre_b"][None, :])

    # --- transformer: one fused Pallas call per ResidualAttentionBlock ---
    resblock_call = pl.pallas_call(
        _resblock_kernel,
        out_shape=jax.ShapeDtypeStruct((N, L, width), dtype),
        grid_spec=pltpu.PrefetchScalarGridSpec(
            num_scalar_prefetch=0,
            grid=grid,
            in_specs=[
                _tiled((b_tile, L, width)),                           # x
                _rep((1, width)), _rep((1, width)),                   # ln1 g/b
                _rep((width, width)), _rep((width, width)), _rep((width, width)),
                _rep((1, width)), _rep((1, width)), _rep((1, width)),  # bq/bk/bv
                _rep((heads, head_dim, width)),                        # Wo^T per head
                _rep((1, width)),                                      # bo
                _rep((1, width)), _rep((1, width)),                    # ln2 g/b
                _rep((width, ffn)), _rep((1, ffn)),                    # W1^T / b1
                _rep((ffn, width)), _rep((1, width)),                  # W2^T / b2
            ],
            out_specs=_tiled((b_tile, L, width)),
        ),
        compiler_params=cparams,
    )

    scale = float(head_dim) ** -0.5
    for lyr in params["layers"]:
        tokens = resblock_call(
            tokens,
            lyr["ln1_g"][None, :], lyr["ln1_b"][None, :],
            (scale * lyr["wq"]).T, lyr["wk"].T, lyr["wv"].T,            # scaling folded
            (scale * lyr["bq"])[None, :], lyr["bk"][None, :], lyr["bv"][None, :],
            lyr["wo"].T.reshape(heads, head_dim, width), lyr["bo"][None, :],
            lyr["ln2_g"][None, :], lyr["ln2_b"][None, :],
            lyr["w1"].T, lyr["b1"][None, :],
            lyr["w2"].T, lyr["b2"][None, :],
        )

    # --- ln_post on class token + projection ---
    cls_tok = tokens[:, 0, :]                                  # layout slice only
    out_dim = params["proj"].shape[1]
    out = pl.pallas_call(
        _ln_post_proj_kernel,
        out_shape=jax.ShapeDtypeStruct((N, out_dim), dtype),
        grid_spec=pltpu.PrefetchScalarGridSpec(
            num_scalar_prefetch=0,
            grid=(1,),
            in_specs=[_rep((N, width)), _rep((1, width)), _rep((1, width)),
                      _rep((width, out_dim))],
            out_specs=_rep((N, out_dim)),
        ),
        compiler_params=cparams,
    )(cls_tok, params["ln_post_g"][None, :], params["ln_post_b"][None, :],
      params["proj"])
    return out


# ------------------------- parameters & JAX reference ------------------------

def init_params(key, *, input_resolution, patch_size, width, layers, heads,
                output_dim, in_ch=3, dtype=jnp.float32):
    P = (input_resolution // patch_size) ** 2
    scale = width ** -0.5
    ks = jax.random.split(key, 8 + layers)

    def rnd(k, shape, s):
        return (s * jax.random.normal(k, shape)).astype(dtype)

    params = {
        "conv_w": rnd(ks[0], (width, in_ch, patch_size, patch_size), 0.05),
        "cls": (scale * jax.random.normal(ks[1], (width,))).astype(dtype),
        "pos": (scale * jax.random.normal(ks[2], (P + 1, width))).astype(dtype),
        "ln_pre_g": jnp.ones((width,), dtype) + rnd(ks[3], (width,), 0.01),
        "ln_pre_b": rnd(ks[4], (width,), 0.01),
        "ln_post_g": jnp.ones((width,), dtype) + rnd(ks[5], (width,), 0.01),
        "ln_post_b": rnd(ks[6], (width,), 0.01),
        "proj": (scale * jax.random.normal(ks[7], (width, output_dim))).astype(dtype),
        "layers": [],
    }
    for li in range(layers):
        lk = jax.random.split(ks[8 + li], 16)
        params["layers"].append({
            "ln1_g": jnp.ones((width,), dtype) + rnd(lk[0], (width,), 0.01),
            "ln1_b": rnd(lk[1], (width,), 0.01),
            "wq": rnd(lk[2], (width, width), width ** -0.5),
            "wk": rnd(lk[3], (width, width), width ** -0.5),
            "wv": rnd(lk[4], (width, width), width ** -0.5),
            "bq": rnd(lk[5], (width,), 0.02),
            "bk": rnd(lk[6], (width,), 0.02),
            "bv": rnd(lk[7], (width,), 0.02),
            "wo": rnd(lk[8], (width, width), width ** -0.5),
            "bo": rnd(lk[9], (width,), 0.02),
            "ln2_g": jnp.ones((width,), dtype) + rnd(lk[10], (width,), 0.01),
            "ln2_b": rnd(lk[11], (width,), 0.01),
            "w1": rnd(lk[12], (4 * width, width), width ** -0.5),
            "b1": rnd(lk[13], (4 * width,), 0.02),
            "w2": rnd(lk[14], (width, 4 * width), (4 * width) ** -0.5),
            "b2": rnd(lk[15], (width,), 0.02),
        })
    return params


def _ln_ref(x, g, b, eps=1e-5):
    mu = jnp.mean(x, axis=-1, keepdims=True)
    var = jnp.mean((x - mu) ** 2, axis=-1, keepdims=True)
    return (x - mu) / jnp.sqrt(var + eps) * g + b


def reference_forward(x, params, *, patch_size, heads):
    """Pure-JAX mirror of VisualTransformer.forward (PyTorch semantics)."""
    N, C, Hh, Ww = x.shape
    ps = patch_size
    gh, gw = Hh // ps, Ww // ps
    P = gh * gw
    width = params["conv_w"].shape[0]
    head_dim = width // heads

    patches = x.reshape(N, C, gh, ps, gw, ps).transpose(0, 2, 4, 1, 3, 5)
    patches = patches.reshape(N, P, C * ps * ps)
    emb = patches @ params["conv_w"].reshape(width, -1).T            # conv1
    cls = jnp.broadcast_to(params["cls"], (N, 1, width))
    t = jnp.concatenate([cls, emb], axis=1) + params["pos"][None]
    t = _ln_ref(t, params["ln_pre_g"], params["ln_pre_b"])

    for lyr in params["layers"]:
        h = _ln_ref(t, lyr["ln1_g"], lyr["ln1_b"])                   # note: CLIP block
        q = (h @ lyr["wq"].T + lyr["bq"]) * (float(head_dim) ** -0.5)
        k = h @ lyr["wk"].T + lyr["bk"]
        v = h @ lyr["wv"].T + lyr["bv"]
        L = h.shape[1]
        qh = q.reshape(N, L, heads, head_dim)
        kh = k.reshape(N, L, heads, head_dim)
        vh = v.reshape(N, L, heads, head_dim)
        s = jnp.einsum("nlhd,nmhd->nhlm", qh, kh)
        a = jax.nn.softmax(s, axis=-1)
        o = jnp.einsum("nhlm,nmhd->nlhd", a, vh).reshape(N, L, width)
        h = h + (o @ lyr["wo"].T + lyr["bo"])
        y = _ln_ref(h, lyr["ln2_g"], lyr["ln2_b"])
        z = y @ lyr["w1"].T + lyr["b1"]
        z = z * jax.nn.sigmoid(1.702 * z)                            # QuickGELU
        h = h + (z @ lyr["w2"].T + lyr["b2"])
        t = h

    cls_out = _ln_ref(t[:, 0, :], params["ln_post_g"], params["ln_post_b"])
    return cls_out @ params["proj"]


# ----------------------------------- main ------------------------------------

if __name__ == "__main__":
    INPUT_RES = 16     # input resolution
    PATCH = 8          # patch size -> 4 patches + 1 class token = 5 tokens
    WIDTH = 32         # model width
    LAYERS = 2
    HEADS = 4          # head_dim = 8
    OUT_DIM = 16
    N = 2              # batch

    root = jax.random.PRNGKey(0)
    kx, kp = jax.random.split(root)
    x = jax.random.normal(kx, (N, 3, INPUT_RES, INPUT_RES), dtype=jnp.float32)
    params = init_params(kp, input_resolution=INPUT_RES, patch_size=PATCH,
                         width=WIDTH, layers=LAYERS, heads=HEADS,
                         output_dim=OUT_DIM)

    out = visual_transformer_forward(x, params, patch_size=PATCH, heads=HEADS)
    out = jax.block_until_ready(out)

    ref = reference_forward(x, params, patch_size=PATCH, heads=HEADS)
    assert out.shape == (N, OUT_DIM)
    # loose tolerance: the in-kernel softmax uses the EUP approximate reciprocal
    max_diff = float(jnp.max(jnp.abs(out - ref)))
    assert max_diff < 1e-2, f"mismatch vs reference: max |diff| = {max_diff}"
    print("KERNEL_OK")
</pallas_src>

<mosaic_0001>
module attributes {stable_mosaic.version = 11 : i64} {
  func.func @_embed_ln_pre_kernel(%arg0: i32, %arg1: memref<2x5x192xf32, #tpu.memory_space<vmem>>, %arg2: memref<192x32xf32, #tpu.memory_space<vmem>>, %arg3: memref<5x32xf32, #tpu.memory_space<vmem>>, %arg4: memref<1x32xf32, #tpu.memory_space<vmem>>, %arg5: memref<1x32xf32, #tpu.memory_space<vmem>>, %arg6: memref<2x5x32xf32, #tpu.memory_space<vmem>>) attributes {dimension_semantics = [#tpu.dimension_semantics<parallel>], iteration_bounds = array<i64: 1>, scalar_prefetch = 0 : i64, scratch_operands = 0 : i64, tpu.core_type = #tpu.core_type<tc>, window_params = [{transform_indices = @transform_0, window_bounds = array<i64: 2, 5, 192>}, {pipeline_mode = #tpu.pipeline_mode<synchronous>, transform_indices = @transform_1, window_bounds = array<i64: 192, 32>}, {pipeline_mode = #tpu.pipeline_mode<synchronous>, transform_indices = @transform_2, window_bounds = array<i64: 5, 32>}, {pipeline_mode = #tpu.pipeline_mode<synchronous>, transform_indices = @transform_3, window_bounds = array<i64: 1, 32>}, {pipeline_mode = #tpu.pipeline_mode<synchronous>, transform_indices = @transform_4, window_bounds = array<i64: 1, 32>}, {transform_indices = @transform_5, window_bounds = array<i64: 2, 5, 32>}]} {
    %c0 = arith.constant 0 : index
    %c0_0 = arith.constant 0 : index
    %0 = vector.load %arg2[%c0, %c0_0] : memref<192x32xf32, #tpu.memory_space<vmem>>, vector<192x32xf32>
    %c0_1 = arith.constant 0 : index
    %c0_2 = arith.constant 0 : index
    %1 = vector.load %arg3[%c0_1, %c0_2] : memref<5x32xf32, #tpu.memory_space<vmem>>, vector<5x32xf32>
    %c0_3 = arith.constant 0 : index
    %c0_4 = arith.constant 0 : index
    %2 = vector.load %arg4[%c0_3, %c0_4] : memref<1x32xf32, #tpu.memory_space<vmem>>, vector<1x32xf32>
    %c0_5 = arith.constant 0 : index
    %c0_6 = arith.constant 0 : index
    %3 = vector.load %arg5[%c0_5, %c0_6] : memref<1x32xf32, #tpu.memory_space<vmem>>, vector<1x32xf32>
    %c0_7 = arith.constant 0 : index
    %c0_8 = arith.constant 0 : index
    %c0_9 = arith.constant 0 : index
    %4 = vector.load %arg1[%c0_7, %c0_8, %c0_9] : memref<2x5x192xf32, #tpu.memory_space<vmem>>, vector<1x5x192xf32>
    %5 = vector.shape_cast %4 : vector<1x5x192xf32> to vector<5x192xf32>
    %cst = arith.constant dense<0.000000e+00> : vector<5x32xf32>
    %6 = tpu.matmul %5, %0, %cst {dimension_numbers = #tpu.dot_dimension_numbers<[1], [0], [0], [1], [0, 0, 1, 1], [], []>} : vector<5x192xf32>, vector<192x32xf32>, vector<5x32xf32> -> vector<5x32xf32>
    %7 = arith.addf %6, %1 : vector<5x32xf32>
    %cst_10 = arith.constant dense<0.000000e+00> : vector<5xf32>
    %8 = vector.multi_reduction <add>, %7, %cst_10 [1] : vector<5x32xf32> to vector<5xf32>
    %9 = vector.shape_cast %8 : vector<5xf32> to vector<5x1xf32>
    %cst_11 = arith.constant 3.200000e+01 : f32
    %10 = vector.broadcast %cst_11 : f32 to vector<5x1xf32>
    %11 = arith.divf %9, %10 : vector<5x1xf32>
    %12 = vector.broadcast %11 : vector<5x1xf32> to vector<5x32xf32>
    %13 = arith.subf %7, %12 : vector<5x32xf32>
    %14 = arith.mulf %13, %13 : vector<5x32xf32>
    %cst_12 = arith.constant dense<0.000000e+00> : vector<5xf32>
    %15 = vector.multi_reduction <add>, %14, %cst_12 [1] : vector<5x32xf32> to vector<5xf32>
    %16 = vector.shape_cast %15 : vector<5xf32> to vector<5x1xf32>
    %cst_13 = arith.constant 3.200000e+01 : f32
    %17 = vector.broadcast %cst_13 : f32 to vector<5x1xf32>
    %18 = arith.divf %16, %17 : vector<5x1xf32>
    %cst_14 = arith.constant 9.99999974E-6 : f32
    %19 = vector.broadcast %cst_14 : f32 to vector<5x1xf32>
    %20 = arith.addf %18, %19 : vector<5x1xf32>
    %21 = math.rsqrt %20 : vector<5x1xf32>
    %22 = vector.broadcast %21 : vector<5x1xf32> to vector<5x32xf32>
    %23 = arith.mulf %13, %22 : vector<5x32xf32>
    %24 = vector.broadcast %2 : vector<1x32xf32> to vector<5x32xf32>
    %25 = arith.mulf %23, %24 : vector<5x32xf32>
    %26 = vector.broadcast %3 : vector<1x32xf32> to vector<5x32xf32>
    %27 = arith.addf %25, %26 : vector<5x32xf32>
    %c0_15 = arith.constant 0 : index
    %c0_16 = arith.constant 0 : index
    %c0_17 = arith.constant 0 : index
    %28 = vector.load %arg6[%c0_15, %c0_16, %c0_17] : memref<2x5x32xf32, #tpu.memory_space<vmem>>, vector<1x5x32xf32>
    %29 = vector.shape_cast %28 : vector<1x5x32xf32> to vector<5x32xf32>
    %30 = vector.shape_cast %27 : vector<5x32xf32> to vector<1x5x32xf32>
    tpu.vector_store %arg6[%c0_15, %c0_16, %c0_17], %30 {strides = array<i32>} : memref<2x5x32xf32, #tpu.memory_space<vmem>>, vector<1x5x32xf32>,
    %c1 = arith.constant 1 : index
    %c0_18 = arith.constant 0 : index
    %c0_19 = arith.constant 0 : index
    %31 = vector.load %arg1[%c1, %c0_18, %c0_19] : memref<2x5x192xf32, #tpu.memory_space<vmem>>, vector<1x5x192xf32>
    %32 = vector.shape_cast %31 : vector<1x5x192xf32> to vector<5x192xf32>
    %cst_20 = arith.constant dense<0.000000e+00> : vector<5x32xf32>
    %33 = tpu.matmul %32, %0, %cst_20 {dimension_numbers = #tpu.dot_dimension_numbers<[1], [0], [0], [1], [0, 0, 1, 1], [], []>} : vector<5x192xf32>, vector<192x32xf32>, vector<5x32xf32> -> vector<5x32xf32>
    %34 = arith.addf %33, %1 : vector<5x32xf32>
    %cst_21 = arith.constant dense<0.000000e+00> : vector<5xf32>
    %35 = vector.multi_reduction <add>, %34, %cst_21 [1] : vector<5x32xf32> to vector<5xf32>
    %36 = vector.shape_cast %35 : vector<5xf32> to vector<5x1xf32>
    %cst_22 = arith.constant 3.200000e+01 : f32
    %37 = vector.broadcast %cst_22 : f32 to vector<5x1xf32>
    %38 = arith.divf %36, %37 : vector<5x1xf32>
    %39 = vector.broadcast %38 : vector<5x1xf32> to vector<5x32xf32>
    %40 = arith.subf %34, %39 : vector<5x32xf32>
    %41 = arith.mulf %40, %40 : vector<5x32xf32>
    %cst_23 = arith.constant dense<0.000000e+00> : vector<5xf32>
    %42 = vector.multi_reduction <add>, %41, %cst_23 [1] : vector<5x32xf32> to vector<5xf32>
    %43 = vector.shape_cast %42 : vector<5xf32> to vector<5x1xf32>
    %cst_24 = arith.constant 3.200000e+01 : f32
    %44 = vector.broadcast %cst_24 : f32 to vector<5x1xf32>
    %45 = arith.divf %43, %44 : vector<5x1xf32>
    %cst_25 = arith.constant 9.99999974E-6 : f32
    %46 = vector.broadcast %cst_25 : f32 to vector<5x1xf32>
    %47 = arith.addf %45, %46 : vector<5x1xf32>
    %48 = math.rsqrt %47 : vector<5x1xf32>
    %49 = vector.broadcast %48 : vector<5x1xf32> to vector<5x32xf32>
    %50 = arith.mulf %40, %49 : vector<5x32xf32>
    %51 = vector.broadcast %2 : vector<1x32xf32> to vector<5x32xf32>
    %52 = arith.mulf %50, %51 : vector<5x32xf32>
    %53 = vector.broadcast %3 : vector<1x32xf32> to vector<5x32xf32>
    %54 = arith.addf %52, %53 : vector<5x32xf32>
    %c1_26 = arith.constant 1 : index
    %c0_27 = arith.constant 0 : index
    %c0_28 = arith.constant 0 : index
    %55 = vector.load %arg6[%c1_26, %c0_27, %c0_28] : memref<2x5x32xf32, #tpu.memory_space<vmem>>, vector<1x5x32xf32>
    %56 = vector.shape_cast %55 : vector<1x5x32xf32> to vector<5x32xf32>
    %57 = vector.shape_cast %54 : vector<5x32xf32> to vector<1x5x32xf32>
    tpu.vector_store %arg6[%c1_26, %c0_27, %c0_28], %57 {strides = array<i32>} : memref<2x5x32xf32, #tpu.memory_space<vmem>>, vector<1x5x32xf32>,
    return
  }
  func.func @transform_0(%arg0: i32) -> (i32, i32, i32) {
    %c0_i32 = arith.constant 0 : i32
    %c0_i32_0 = arith.constant 0 : i32
    %c0_i32_1 = arith.constant 0 : i32
    return %arg0, %c0_i32, %c0_i32_0 : i32, i32, i32
  }
  func.func @transform_1(%arg0: i32) -> (i32, i32) {
    %c0_i32 = arith.constant 0 : i32
    %c0_i32_0 = arith.constant 0 : i32
    %c0_i32_1 = arith.constant 0 : i32
    return %c0_i32, %c0_i32_0 : i32, i32
  }
  func.func @transform_2(%arg0: i32) -> (i32, i32) {
    %c0_i32 = arith.constant 0 : i32
    %c0_i32_0 = arith.constant 0 : i32
    %c0_i32_1 = arith.constant 0 : i32
    return %c0_i32, %c0_i32_0 : i32, i32
  }
  func.func @transform_3(%arg0: i32) -> (i32, i32) {
    %c0_i32 = arith.constant 0 : i32
    %c0_i32_0 = arith.constant 0 : i32
    %c0_i32_1 = arith.constant 0 : i32
    return %c0_i32, %c0_i32_0 : i32, i32
  }
  func.func @transform_4(%arg0: i32) -> (i32, i32) {
    %c0_i32 = arith.constant 0 : i32
    %c0_i32_0 = arith.constant 0 : i32
    %c0_i32_1 = arith.constant 0 : i32
    return %c0_i32, %c0_i32_0 : i32, i32
  }
  func.func @transform_5(%arg0: i32) -> (i32, i32, i32) {
    %c0_i32 = arith.constant 0 : i32
    %c0_i32_0 = arith.constant 0 : i32
    %c0_i32_1 = arith.constant 0 : i32
    return %arg0, %c0_i32, %c0_i32_0 : i32, i32, i32
  }
}

</mosaic_0001>

<bundles_post_ra>
// kernel: tpu_custom_call.1
= control target key start
LH: loop header
LB: loop body
LE: loop exit
PB: predicated region body
PF: predicated region fallthrough
CT: control target
= control target key end

     0   :  { %v262_v0 = vmov 0.0   ;;  %vm49_vm0 = vcmask 523264   ;;  %vm123_vm1 = vcmask 258048   ;;  %s448_s1 = inlined_call_operand.vmem [shape: f32[192,32], index: 1, kind: input, shape index: {}]   ;;  %s449_s0 = inlined_call_operand.vmem [shape: f32[2,5,192], index: 0, kind: input, shape index: {}]   ;;  %s450_s2 = inlined_call_operand.vmem [shape: f32[5,32], index: 2, kind: input, shape index: {}]   ;;  %s451_s3 = inlined_call_operand.vmem [shape: f32[1,32], index: 3, kind: input, shape index: {}]   ;;  %s452_s4 = inlined_call_operand.vmem [shape: f32[1,32], index: 4, kind: input, shape index: {}]   ;;  %s453_s5 = inlined_call_operand.vmem [shape: f32[2,5,32], index: 5, kind: output, shape index: {}]  }
   0x1   :  { %53 = vmatprep.subr.mxu0 %v262_v0  ;;  %v35_v1 = vld [vmem:[%s448_s1 + $0x78] sm:$0xff]  ;;  %159 = vmatprep.subr.mxu1 %v262_v0  ;;  %v34_v2 = vld [vmem:[%s448_s1 + $0x70] sm:$0xff]  ;;  %v33_v3 = vld [vmem:[%s448_s1 + $0x68] sm:$0xff] }
   0x2   :  { %54 = vmatpush1.msra.mxu0 %v35_v1  ;;  %160 = vmatpush1.msra.mxu1 %v35_v1  ;;  %v32_v4 = vld [vmem:[%s448_s1 + $0x60] sm:$0xff]  ;;  %v31_v5 = vld [vmem:[%s448_s1 + $0x58] sm:$0xff]  ;;  %v30_v6 = vld [vmem:[%s448_s1 + $0x50] sm:$0xff] }
   0x3   :  { %55 = vmatprep.subr.mxu0 %v262_v0  ;;  %161 = vmatprep.subr.mxu1 %v262_v0  ;;  %v29_v7 = vld [vmem:[%s448_s1 + $0x48] sm:$0xff]  ;;  %v28_v8 = vld [vmem:[%s448_s1 + $0x40] sm:$0xff]  ;;  %v27_v9 = vld [vmem:[%s448_s1 + $0x38] sm:$0xff] }
   0x4   :  { %56 = vmatpush1.msra.mxu0 %v34_v2  ;;  %162 = vmatpush1.msra.mxu1 %v34_v2  ;;  %v26_v10 = vld [vmem:[%s448_s1 + $0x30] sm:$0xff]  ;;  %v25_v11 = vld [vmem:[%s448_s1 + $0x28] sm:$0xff]  ;;  %v24_v12 = vld [vmem:[%s448_s1 + $0x20] sm:$0xff] }
   0x5   :  { %57 = vmatprep.subr.mxu0 %v262_v0  ;;  %163 = vmatprep.subr.mxu1 %v262_v0  ;;  %v23_v13 = vld [vmem:[%s448_s1 + $0x18] sm:$0xff]  ;;  %v22_v14 = vld [vmem:[%s448_s1 + $0x10] sm:$0xff]  ;;  %v21_v15 = vld [vmem:[%s448_s1 + $0x8] sm:$0xff] }
   0x6   :  { %58 = vmatpush1.msra.mxu0 %v33_v3  ;;  %164 = vmatpush1.msra.mxu1 %v33_v3  ;;  %v20_v16 = vld [vmem:[%s448_s1] sm:$0xff]  ;;  %v43_v17 = vld [vmem:[%s448_s1 + $0xb8] sm:$0xff]  ;;  %v42_v18 = vld [vmem:[%s448_s1 + $0xb0] sm:$0xff] }
   0x7   :  { %59 = vmatprep.subr.mxu0 %v262_v0  ;;  %165 = vmatprep.subr.mxu1 %v262_v0  ;;  %v41_v19 = vld [vmem:[%s448_s1 + $0xa8] sm:$0xff]  ;;  %v40_v20 = vld [vmem:[%s448_s1 + $0xa0] sm:$0xff]  ;;  %v39_v21 = vld [vmem:[%s448_s1 + $0x98] sm:$0xff] }
   0x8   :  { %60 = vmatpush1.msra.mxu0 %v32_v4  ;;  %166 = vmatpush1.msra.mxu1 %v32_v4  ;;  %v38_v22 = vld [vmem:[%s448_s1 + $0x90] sm:$0xff]  ;;  %v37_v23 = vld [vmem:[%s448_s1 + $0x88] sm:$0xff]  ;;  %v36_v25 = vld [vmem:[%s448_s1 + $0x80] sm:$0xff] }
   0x9   :  { %61 = vmatprep.subr.mxu0 %v262_v0  ;;  %167 = vmatprep.subr.mxu1 %v262_v0  ;;  %v48_v24 = vld [vmem:[%s449_s0 + $0x8] sm:$0x1f]  ;;  %v47_v26 = vld [vmem:[%s449_s0] sm:$0x1f]  ;;  %v254_v27 = vld [vmem:[%s449_s0 + $0x18] sm:$0x1f] }
   0xa   :  { %62 = vmatpush1.msra.mxu0 %v31_v5  ;;  %168 = vmatpush1.msra.mxu1 %v31_v5  ;;  %v253_v28 = vld [vmem:[%s449_s0 + $0x10] sm:$0x1f]  ;;  %v44_v29 = vld [vmem:[%s450_s2] sm:$0x1f] }
   0xb   :  { %63 = vmatprep.subr.mxu0 %v262_v0  ;;  %169 = vmatprep.subr.mxu1 %v262_v0  ;;  %v251_v55 = vld [vmem:[%s451_s3] ss:$0 sm:$0xff] }
   0xc   :  { %64 = vmatpush1.msra.mxu0 %v30_v6  ;;  %170 = vmatpush1.msra.mxu1 %v30_v6  ;;  %v252_v57 = vld [vmem:[%s452_s4] ss:$0 sm:$0xff] }
   0xd   :  { %65 = vmatprep.subr.mxu0 %v262_v0  ;;  %171 = vmatprep.subr.mxu1 %v262_v0 }
   0xe   :  { %66 = vmatpush1.msra.mxu0 %v29_v7  ;;  %172 = vmatpush1.msra.mxu1 %v29_v7 }
   0xf   :  { %67 = vmatprep.subr.mxu0 %v262_v0  ;;  %173 = vmatprep.subr.mxu1 %v262_v0 }
  0x10   :  { %68 = vmatpush1.msra.mxu0 %v28_v8  ;;  %174 = vmatpush1.msra.mxu1 %v28_v8 }
  0x11   :  { %69 = vmatprep.subr.mxu0 %v262_v0  ;;  %175 = vmatprep.subr.mxu1 %v262_v0 }
  0x12   :  { %70 = vmatpush1.msra.mxu0 %v27_v9  ;;  %176 = vmatpush1.msra.mxu1 %v27_v9 }
  0x13   :  { %71 = vmatprep.subr.mxu0 %v262_v0  ;;  %177 = vmatprep.subr.mxu1 %v262_v0 }
  0x14   :  { %72 = vmatpush1.msra.mxu0 %v26_v10  ;;  %178 = vmatpush1.msra.mxu1 %v26_v10 }
  0x15   :  { %73 = vmatprep.subr.mxu0 %v262_v0  ;;  %179 = vmatprep.subr.mxu1 %v262_v0 }
  0x16   :  { %74 = vmatpush1.msra.mxu0 %v25_v11  ;;  %180 = vmatpush1.msra.mxu1 %v25_v11 }
  0x17   :  { %75 = vmatprep.subr.mxu0 %v262_v0  ;;  %181 = vmatprep.subr.mxu1 %v262_v0 }
  0x18   :  { %76 = vmatpush1.msra.mxu0 %v24_v12  ;;  %182 = vmatpush1.msra.mxu1 %v24_v12 }
  0x19   :  { %77 = vmatprep.subr.mxu0 %v262_v0  ;;  %183 = vmatprep.subr.mxu1 %v262_v0 }
  0x1a   :  { %78 = vmatpush1.msra.mxu0 %v23_v13  ;;  %184 = vmatpush1.msra.mxu1 %v23_v13 }
  0x1b   :  { %79 = vmatprep.subr.mxu0 %v262_v0  ;;  %185 = vmatprep.subr.mxu1 %v262_v0 }
  0x1c   :  { %80 = vmatpush1.msra.mxu0 %v22_v14  ;;  %186 = vmatpush1.msra.mxu1 %v22_v14 }
  0x1d   :  { %81 = vmatprep.subr.mxu0 %v262_v0  ;;  %187 = vmatprep.subr.mxu1 %v262_v0 }
  0x1e   :  { %82 = vmatpush1.msra.mxu0 %v21_v15  ;;  %188 = vmatpush1.msra.mxu1 %v21_v15 }
  0x1f   :  { %83 = vmatprep.subr.mxu0 %v262_v0  ;;  %189 = vmatprep.subr.mxu1 %v262_v0 }
  0x20   :  { %84 = vmatpush1.msra.mxu0 %v20_v16  ;;  %190 = vmatpush1.msra.mxu1 %v20_v16 }
  0x21   :  { %101 = vmatprep.subr.mxu0 %v262_v0  ;;  %207 = vmatprep.subr.mxu1 %v262_v0 }
  0x22   :  { %102 = vmatpush2.msra.mxu0 %v43_v17  ;;  %208 = vmatpush2.msra.mxu1 %v43_v17 }
  0x23   :  { %103 = vmatprep.subr.mxu0 %v262_v0  ;;  %209 = vmatprep.subr.mxu1 %v262_v0 }
  0x24   :  { %104 = vmatpush2.msra.mxu0 %v42_v18  ;;  %210 = vmatpush2.msra.mxu1 %v42_v18 }
  0x25   :  { %105 = vmatprep.subr.mxu0 %v262_v0  ;;  %211 = vmatprep.subr.mxu1 %v262_v0 }
  0x26   :  { %106 = vmatpush2.msra.mxu0 %v41_v19  ;;  %212 = vmatpush2.msra.mxu1 %v41_v19 }
  0x27   :  { %107 = vmatprep.subr.mxu0 %v262_v0  ;;  %213 = vmatprep.subr.mxu1 %v262_v0 }
  0x28   :  { %108 = vmatpush2.msra.mxu0 %v40_v20  ;;  %214 = vmatpush2.msra.mxu1 %v40_v20 }
  0x29   :  { %109 = vmatprep.subr.mxu0 %v262_v0  ;;  %215 = vmatprep.subr.mxu1 %v262_v0 }
  0x2a   :  { %110 = vmatpush2.msra.mxu0 %v39_v21  ;;  %216 = vmatpush2.msra.mxu1 %v39_v21 }
  0x2b   :  { %111 = vmatprep.subr.mxu0 %v262_v0  ;;  %217 = vmatprep.subr.mxu1 %v262_v0 }
  0x2c   :  { %112 = vmatpush2.msra.mxu0 %v38_v22  ;;  %218 = vmatpush2.msra.mxu1 %v38_v22 }
  0x2d   :  { %113 = vmatprep.subr.mxu0 %v262_v0  ;;  %219 = vmatprep.subr.mxu1 %v262_v0 }
  0x2e   :  { %114 = vmatpush2.msra.mxu0 %v37_v23  ;;  %250 = vmatprep.mubr.msk.f32.mxu0 %vm49_vm0, %v48_v24 }
  0x2f   :  { %115 = vmatprep.subr.mxu0 %v262_v0  ;;  %220 = vmatpush2.msra.mxu1 %v37_v23 }
  0x30   :  { %116 = vmatpush2.msra.mxu0 %v36_v25  ;;  %221 = vmatprep.subr.mxu1 %v262_v0 }
  0x31   :  { %118 = vmatmul.mubr.f32.vlgmr.msra.gmra.mxu0 %v47_v26  ;;  %222 = vmatpush2.msra.mxu1 %v36_v25 }
  0x32   :  { %255 = vmatprep.mubr.msk.f32.mxu1 %vm49_vm0, %v254_v27 }
  0x33   :  { %224 = vmatmul.mubr.f32.vlgmr.msra.gmra.mxu1 %v253_v28 }
  0xf1   :  { %v119_v30 = vpop.f32.mrf.mxu0 }
  0xf2   :  { %v120_v31 = vadd.f32 %v119_v30, %v44_v29 }
  0xf3   :  { %v121_v32 = vpop.f32.mrf.mxu0  ;;  %v225_v33 = vpop.f32.mrf.mxu1 }
  0xf4   :  { %v226_v34 = vadd.f32 %v225_v33, %v44_v29  ;;  %v124_v35 = vsel %vm123_vm1, %v120_v31, 0.0 }
  0xf5   :  { %v227_v36 = vpop.f32.mrf.mxu1  ;;  %125 = vadd.xlane.f32.xlu0 %v124_v35 }
  0xf6   :  { %v229_v37 = vsel %vm123_vm1, %v226_v34, 0.0 }
  0xf9   :  { %230 = vadd.xlane.f32.xlu0 %v229_v37 }
 0x17e   :  { %v126_v38 = vpop.xlane.xlu0 %125 }
 0x17f   :  { %v128_v39 = vmul.f32 0.03125, %v126_v38 }
 0x181   :  { %v129_v40 = vsub.f32 %v120_v31, %v128_v39 }
 0x182   :  { %v231_v41 = vpop.xlane.xlu0 %230 }
 0x183   :  { %v232_v42 = vmul.f32 0.03125, %v231_v41  ;;  %v130_v43 = vmul.f32 %v129_v40, %v129_v40 }
 0x185   :  { %v233_v44 = vsub.f32 %v226_v34, %v232_v42  ;;  %v131_v45 = vsel %vm123_vm1, %v130_v43, 0.0 }
 0x186   :  { %132 = vadd.xlane.f32.xlu1 %v131_v45 }
 0x187   :  { %v234_v46 = vmul.f32 %v233_v44, %v233_v44 }
 0x189   :  { %v235_v47 = vsel %vm123_vm1, %v234_v46, 0.0 }
 0x18a   :  { %236 = vadd.xlane.f32.xlu1 %v235_v47 }
 0x20f   :  { %v133_v48 = vpop.xlane.xlu1 %132 }
 0x210   :  { %v134_v49 = vmul.f32 0.03125, %v133_v48 }
 0x212   :  { %v135_v50 = vadd.f32 1e-05, %v134_v49 }
 0x213   :  { %v237_v51 = vpop.xlane.xlu1 %236 }
 0x214   :  { %258 = vrsqrt.f32 %v135_v50  ;;  %v238_v52 = vmul.f32 0.03125, %v237_v51 }
 0x216   :  { %v239_v53 = vadd.f32 1e-05, %v238_v52 }
 0x218   :  { %260 = vrsqrt.f32 %v239_v53 }
 0x221   :  { %v259_v54 = vpop.eup %258 }
 0x222   :  { %v137_v56 = vmul.f32 %v259_v54, %v129_v40 }
 0x224   :  { %v144_v58 = vmul.f32 %v251_v55, %v137_v56 }
 0x225   :  { %v261_v59 = vpop.eup %260 }
 0x226   :  { %v151_v60 = vadd.f32 %v252_v57, %v144_v58  ;;  %v241_v61 = vmul.f32 %v261_v59, %v233_v44 }
 0x228   :  { %152 = vst.msk [vmem:[%s453_s5] sm:$0x1f] %vm123_vm1, %v151_v60  ;;  %v242_v62 = vmul.f32 %v251_v55, %v241_v61 }
 0x22a   :  { %v243_v63 = vadd.f32 %v252_v57, %v242_v62 }
 0x22c   :  { %256 = vst.msk [vmem:[%s453_s5 + $0x8] sm:$0x1f] %vm123_vm1, %v243_v63 }

</bundles_post_ra>
